<compile_context>
chip_gen: v6e
topology: v6e:2x2x1
jax: 0.10.0
libtpu: 0.0.40
codegen_flags: <defaults>
</compile_context>

<pallas_src>
import functools

import jax
import jax.numpy as jnp
from jax import lax
from jax.experimental import pallas as pl
from jax.experimental.pallas import tpu as pltpu
import numpy as np


# ---------------------------------------------------------------------------
# Pallas kernel (entire forward, fused)
# ---------------------------------------------------------------------------

def _full_spec(shape):
    """Full-array block (grid=(1,)) — block_shape == array shape."""
    nd = len(shape)
    return pl.BlockSpec(shape, lambda i, _nd=nd: (0,) * _nd)


def fused_forward_kernel(
    xu0_ref, mx_ref, mw_ref, mbe_ref, ar_ref, arv_ref,
    w1r_ref, b1r_ref, w1v_ref, b1v_ref,
    w2r_ref, b2r_ref, w2v_ref, b2v_ref,
    iu_ref, im_ref,
    o_ref,
    cat_m_ref, cat_u_ref,
    *, hidden):
    f32, bf16 = jnp.float32, jnp.bfloat16
    H = hidden

    def sage(a_bf, x_src, x_dst, cat_ref, w_ref, b_ref, relu):
        # PyG SAGEConv (mean aggr, root_weight=True):
        #   out = lin_l(mean_{j in N(i)} x_src[j]) + lin_r(x_dst[i])
        # merged into one MXU matmul: [A@x_src | x_dst] @ [[wl];[wr]] + bl
        cat_ref[:, :H] = jnp.dot(a_bf, x_src.astype(bf16),
                                 preferred_element_type=f32)
        cat_ref[:, H:] = x_dst
        out = jnp.dot(cat_ref[...].astype(bf16), w_ref[...],
                      preferred_element_type=f32) + b_ref[...]
        return jnp.maximum(out, 0.0) if relu else out

    # --- node-type initialisation -------------------------------------------
    x_user = xu0_ref[...]                                            # (Nu, H) f32
    # movie_lin(x) + (bias + movie_emb)  (bias+emb pre-folded in the wrapper)
    x_movie = (jnp.dot(mx_ref[...], mw_ref[...], preferred_element_type=f32)
               + mbe_ref[...])                                       # (Nm, H) f32

    a_rates = ar_ref[...]                                            # (Nm, Nu) bf16
    a_rev = arv_ref[...]                                             # (Nu, Nm) bf16

    # --- hetero GNN layer 1 (+ ReLU per node type) ----------------------------
    x_movie_1 = sage(a_rates, x_user, x_movie, cat_m_ref, w1r_ref, b1r_ref, True)
    x_user_1 = sage(a_rev, x_movie, x_user, cat_u_ref, w1v_ref, b1v_ref, True)

    # --- layer 2 (no activation) ----------------------------------------------
    x_movie_2 = sage(a_rates, x_user_1, x_movie_1, cat_m_ref, w2r_ref, b2r_ref, False)
    x_user_2 = sage(a_rev, x_movie_1, x_user_1, cat_u_ref, w2v_ref, b2v_ref, False)

    # --- classifier: scores[0, e] = <x_user_2[iu[e]], x_movie_2[im[e]]> -------
    # lane-dense (1, E_pad) output; padded indices are -1 -> zero one-hot column.
    n_user, n_movie = x_user_2.shape[0], x_movie_2.shape[0]
    e_pad = iu_ref.shape[1]
    # G[u, m] = <x_user_2[u], x_movie_2[m]>   (standard q @ k.T MXU pattern)
    g = lax.dot_general(x_user_2, x_movie_2, (((1,), (1,)), ((), ())),
                        preferred_element_type=f32)                  # (Nu, Nm)
    oh_m = (lax.broadcasted_iota(jnp.int32, (n_movie, e_pad), 0)
            == im_ref[...]).astype(f32)                              # (Nm, Ep)
    t = jnp.dot(g, oh_m, preferred_element_type=f32)                 # (Nu, Ep)
    oh_u = (lax.broadcasted_iota(jnp.int32, (n_user, e_pad), 0)
            == iu_ref[...]).astype(f32)                              # (Nu, Ep)
    o_ref[...] = jnp.sum(oh_u * t, axis=0, keepdims=True)            # (1, Ep)


# ---------------------------------------------------------------------------
# Wrapper: parameter prep (plain XLA, cheap) + single pallas_call
# ---------------------------------------------------------------------------

def model_forward(params, data):
    f32, bf16 = jnp.float32, jnp.bfloat16
    h = params["user_emb"].shape[1]

    # embedding gathers + parameter folding done once in the wrapper
    x_user0 = params["user_emb"][data["user_node_id"]].astype(f32)
    movie_bias_emb = (params["movie_lin_b"]
                      + params["movie_emb"][data["movie_node_id"]]).astype(f32)

    movie_x = data["movie_x"]
    n_movie, feat = movie_x.shape
    n_user = x_user0.shape[0]
    feat_pad = -(-feat // 16) * 16                     # 20 -> 32, MXU/bf16 friendly
    movie_x_p = jnp.pad(movie_x, ((0, 0), (0, feat_pad - feat))).astype(bf16)
    movie_w_p = jnp.pad(params["movie_lin_w"],
                        ((0, feat_pad - feat), (0, 0))).astype(bf16)

    def stack_w(c, rel):   # [[wl];[wr]] -> (2H, H), stacked host-side
        return jnp.concatenate([c[f"{rel}_wl"], c[f"{rel}_wr"]], axis=0).astype(bf16)

    c1, c2 = params["conv1"], params["conv2"]
    w1r, w1v = stack_w(c1, "rates"), stack_w(c1, "rev")
    w2r, w2v = stack_w(c2, "rates"), stack_w(c2, "rev")
    b1r, b1v = c1["rates_bl"].astype(f32), c1["rev_bl"].astype(f32)
    b2r, b2v = c2["rates_bl"].astype(f32), c2["rev_bl"].astype(f32)

    a_rates = data["a_rates"].astype(bf16)             # (Nm, Nu) row-normalized
    a_rev = data["a_rev"].astype(bf16)                 # (Nu, Nm) row-normalized

    eli = data["edge_label_index"]
    e = eli.shape[1]
    e_pad = -(-e // 128) * 128                         # lane-dense output width
    iu = jnp.full((1, e_pad), -1, jnp.int32).at[0, :e].set(eli[0])
    im = jnp.full((1, e_pad), -1, jnp.int32).at[0, :e].set(eli[1])

    inputs = (x_user0, movie_x_p, movie_w_p, movie_bias_emb, a_rates, a_rev,
              w1r, b1r, w1v, b1v, w2r, b2r, w2v, b2v, iu, im)

    out = pl.pallas_call(
        functools.partial(fused_forward_kernel, hidden=h),
        out_shape=jax.ShapeDtypeStruct((1, e_pad), f32),
        grid=(1,),
        in_specs=[_full_spec(x.shape) for x in inputs],
        out_specs=_full_spec((1, e_pad)),
        scratch_shapes=[pltpu.VMEM((n_movie, 2 * h), f32),   # [agg | x_dst] movie-dst
                        pltpu.VMEM((n_user, 2 * h), f32)],   # [agg | x_dst] user-dst
        compiler_params=pltpu.CompilerParams(dimension_semantics=("arbitrary",)),
    )(*inputs)
    return out[0, :e]


# ---------------------------------------------------------------------------
# Pure-JAX f32 reference (gather/scatter semantics, matches PyG SAGEConv mean aggr)
# ---------------------------------------------------------------------------

def _sage_ref(x_src, x_dst, src_idx, dst_idx, n_dst, wl, bl, wr, relu):
    msg = x_src[src_idx]
    summed = jax.ops.segment_sum(msg, dst_idx, num_segments=n_dst)
    cnt = jax.ops.segment_sum(jnp.ones_like(dst_idx, jnp.float32), dst_idx,
                              num_segments=n_dst)
    agg = summed / jnp.maximum(cnt, 1.0)[:, None]
    out = agg @ wl + bl + x_dst @ wr
    return jnp.maximum(out, 0.0) if relu else out


def model_forward_ref(params, data):
    src_u, dst_m = data["edge_index"]          # user -> movie ("rates")
    n_user = params["user_emb"].shape[0]
    n_movie = params["movie_emb"].shape[0]

    x_user = params["user_emb"][data["user_node_id"]]
    x_movie = (data["movie_x"] @ params["movie_lin_w"] + params["movie_lin_b"]
               + params["movie_emb"][data["movie_node_id"]])

    c1 = params["conv1"]
    x_movie_1 = _sage_ref(x_user, x_movie, src_u, dst_m, n_movie,
                          c1["rates_wl"], c1["rates_bl"], c1["rates_wr"], True)
    x_user_1 = _sage_ref(x_movie, x_user, dst_m, src_u, n_user,
                         c1["rev_wl"], c1["rev_bl"], c1["rev_wr"], True)
    c2 = params["conv2"]
    x_movie_2 = _sage_ref(x_user_1, x_movie_1, src_u, dst_m, n_movie,
                          c2["rates_wl"], c2["rates_bl"], c2["rates_wr"], False)
    x_user_2 = _sage_ref(x_movie_1, x_user_1, dst_m, src_u, n_user,
                         c2["rev_wl"], c2["rev_bl"], c2["rev_wr"], False)

    eli = data["edge_label_index"]
    return (x_user_2[eli[0]] * x_movie_2[eli[1]]).sum(-1)


# ---------------------------------------------------------------------------
# Deterministic setup + run
# ---------------------------------------------------------------------------

if __name__ == "__main__":
    H = 32            # hidden_channels
    N_USER = 8
    N_MOVIE = 16
    MOVIE_FEAT = 20
    N_EDGES = 40      # graph edges ('user','rates','movie')
    E_LABEL = 8       # supervision edges (edge_label_index)

    key = jax.random.PRNGKey(0)
    ks = jax.random.split(key, 16)

    def sage_params(k):
        k1, k2, k3, k4, k5, k6 = jax.random.split(k, 6)
        return {
            "rates_wl": 0.1 * jax.random.normal(k1, (H, H), jnp.float32),
            "rates_bl": 0.1 * jax.random.normal(k2, (1, H), jnp.float32),
            "rates_wr": 0.1 * jax.random.normal(k3, (H, H), jnp.float32),
            "rev_wl": 0.1 * jax.random.normal(k4, (H, H), jnp.float32),
            "rev_bl": 0.1 * jax.random.normal(k5, (1, H), jnp.float32),
            "rev_wr": 0.1 * jax.random.normal(k6, (H, H), jnp.float32),
        }

    params = {
        "movie_lin_w": 0.1 * jax.random.normal(ks[0], (MOVIE_FEAT, H), jnp.float32),
        "movie_lin_b": 0.1 * jax.random.normal(ks[1], (1, H), jnp.float32),
        "user_emb": 0.1 * jax.random.normal(ks[2], (N_USER, H), jnp.float32),
        "movie_emb": 0.1 * jax.random.normal(ks[3], (N_MOVIE, H), jnp.float32),
        "conv1": sage_params(ks[4]),
        "conv2": sage_params(ks[5]),
    }

    # Graph: user --rates--> movie (ToUndirected adds the reverse edge type,
    # modeled as the transposed, separately mean-normalized adjacency).
    src_u = jax.random.randint(ks[6], (N_EDGES,), 0, N_USER, jnp.int32)
    dst_m = jax.random.randint(ks[7], (N_EDGES,), 0, N_MOVIE, jnp.int32)
    adj = jnp.zeros((N_MOVIE, N_USER), jnp.float32).at[dst_m, src_u].add(1.0)
    a_rates = adj / jnp.maximum(adj.sum(axis=1, keepdims=True), 1.0)
    adj_t = adj.T
    a_rev = adj_t / jnp.maximum(adj_t.sum(axis=1, keepdims=True), 1.0)

    edge_label_index = jnp.stack([
        jax.random.randint(ks[8], (E_LABEL,), 0, N_USER, jnp.int32),
        jax.random.randint(ks[9], (E_LABEL,), 0, N_MOVIE, jnp.int32),
    ])

    data = {
        "user_node_id": jnp.arange(N_USER, dtype=jnp.int32),
        "movie_node_id": jnp.arange(N_MOVIE, dtype=jnp.int32),
        "movie_x": jax.random.normal(ks[10], (N_MOVIE, MOVIE_FEAT), jnp.float32),
        "edge_index": jnp.stack([src_u, dst_m]),
        "a_rates": a_rates,
        "a_rev": a_rev,
        "edge_label_index": edge_label_index,
    }

    pred = jax.block_until_ready(model_forward(params, data))
    ref = jax.block_until_ready(model_forward_ref(params, data))

    assert pred.shape == (E_LABEL,)
    # bf16 MXU feeds (f32 accumulation) -> looser tolerance vs the f32 reference.
    np.testing.assert_allclose(np.asarray(pred), np.asarray(ref),
                               rtol=5e-2, atol=5e-2)
    print("KERNEL_OK")
</pallas_src>

<mosaic_0001>
module attributes {stable_mosaic.version = 11 : i64} {
  func.func @fused_forward_kernel(%arg0: i32, %arg1: memref<8x32xf32, #tpu.memory_space<vmem>>, %arg2: memref<16x32xbf16, #tpu.memory_space<vmem>>, %arg3: memref<32x32xbf16, #tpu.memory_space<vmem>>, %arg4: memref<16x32xf32, #tpu.memory_space<vmem>>, %arg5: memref<16x8xbf16, #tpu.memory_space<vmem>>, %arg6: memref<8x16xbf16, #tpu.memory_space<vmem>>, %arg7: memref<64x32xbf16, #tpu.memory_space<vmem>>, %arg8: memref<1x32xf32, #tpu.memory_space<vmem>>, %arg9: memref<64x32xbf16, #tpu.memory_space<vmem>>, %arg10: memref<1x32xf32, #tpu.memory_space<vmem>>, %arg11: memref<64x32xbf16, #tpu.memory_space<vmem>>, %arg12: memref<1x32xf32, #tpu.memory_space<vmem>>, %arg13: memref<64x32xbf16, #tpu.memory_space<vmem>>, %arg14: memref<1x32xf32, #tpu.memory_space<vmem>>, %arg15: memref<1x128xi32, #tpu.memory_space<vmem>>, %arg16: memref<1x128xi32, #tpu.memory_space<vmem>>, %arg17: memref<1x128xf32, #tpu.memory_space<vmem>>, %arg18: memref<16x64xf32, #tpu.memory_space<vmem>>, %arg19: memref<8x64xf32, #tpu.memory_space<vmem>>) attributes {dimension_semantics = [#tpu.dimension_semantics<arbitrary>], iteration_bounds = array<i64: 1>, scalar_prefetch = 0 : i64, scratch_operands = 2 : i64, tpu.core_type = #tpu.core_type<tc>, window_params = [{pipeline_mode = #tpu.pipeline_mode<synchronous>, transform_indices = @transform_0, window_bounds = array<i64: 8, 32>}, {pipeline_mode = #tpu.pipeline_mode<synchronous>, transform_indices = @transform_1, window_bounds = array<i64: 16, 32>}, {pipeline_mode = #tpu.pipeline_mode<synchronous>, transform_indices = @transform_2, window_bounds = array<i64: 32, 32>}, {pipeline_mode = #tpu.pipeline_mode<synchronous>, transform_indices = @transform_3, window_bounds = array<i64: 16, 32>}, {pipeline_mode = #tpu.pipeline_mode<synchronous>, transform_indices = @transform_4, window_bounds = array<i64: 16, 8>}, {pipeline_mode = #tpu.pipeline_mode<synchronous>, transform_indices = @transform_5, window_bounds = array<i64: 8, 16>}, {pipeline_mode = #tpu.pipeline_mode<synchronous>, transform_indices = @transform_6, window_bounds = array<i64: 64, 32>}, {pipeline_mode = #tpu.pipeline_mode<synchronous>, transform_indices = @transform_7, window_bounds = array<i64: 1, 32>}, {pipeline_mode = #tpu.pipeline_mode<synchronous>, transform_indices = @transform_8, window_bounds = array<i64: 64, 32>}, {pipeline_mode = #tpu.pipeline_mode<synchronous>, transform_indices = @transform_9, window_bounds = array<i64: 1, 32>}, {pipeline_mode = #tpu.pipeline_mode<synchronous>, transform_indices = @transform_10, window_bounds = array<i64: 64, 32>}, {pipeline_mode = #tpu.pipeline_mode<synchronous>, transform_indices = @transform_11, window_bounds = array<i64: 1, 32>}, {pipeline_mode = #tpu.pipeline_mode<synchronous>, transform_indices = @transform_12, window_bounds = array<i64: 64, 32>}, {pipeline_mode = #tpu.pipeline_mode<synchronous>, transform_indices = @transform_13, window_bounds = array<i64: 1, 32>}, {pipeline_mode = #tpu.pipeline_mode<synchronous>, transform_indices = @transform_14, window_bounds = array<i64: 1, 128>}, {pipeline_mode = #tpu.pipeline_mode<synchronous>, transform_indices = @transform_15, window_bounds = array<i64: 1, 128>}, {pipeline_mode = #tpu.pipeline_mode<synchronous>, transform_indices = @transform_16, window_bounds = array<i64: 1, 128>}]} {
    %c0 = arith.constant 0 : index
    %c0_0 = arith.constant 0 : index
    %0 = vector.load %arg1[%c0, %c0_0] : memref<8x32xf32, #tpu.memory_space<vmem>>, vector<8x32xf32>
    %c0_1 = arith.constant 0 : index
    %c0_2 = arith.constant 0 : index
    %1 = vector.load %arg2[%c0_1, %c0_2] : memref<16x32xbf16, #tpu.memory_space<vmem>>, vector<16x32xbf16>
    %c0_3 = arith.constant 0 : index
    %c0_4 = arith.constant 0 : index
    %2 = vector.load %arg3[%c0_3, %c0_4] : memref<32x32xbf16, #tpu.memory_space<vmem>>, vector<32x32xbf16>
    %cst = arith.constant dense<0.000000e+00> : vector<16x32xf32>
    %3 = tpu.matmul %1, %2, %cst {dimension_numbers = #tpu.dot_dimension_numbers<[1], [0], [0], [1], [0, 0, 1, 1], [], []>} : vector<16x32xbf16>, vector<32x32xbf16>, vector<16x32xf32> -> vector<16x32xf32>
    %c0_5 = arith.constant 0 : index
    %c0_6 = arith.constant 0 : index
    %4 = vector.load %arg4[%c0_5, %c0_6] : memref<16x32xf32, #tpu.memory_space<vmem>>, vector<16x32xf32>
    %5 = arith.addf %3, %4 : vector<16x32xf32>
    %c0_7 = arith.constant 0 : index
    %c0_8 = arith.constant 0 : index
    %6 = vector.load %arg5[%c0_7, %c0_8] : memref<16x8xbf16, #tpu.memory_space<vmem>>, vector<16x8xbf16>
    %c0_9 = arith.constant 0 : index
    %c0_10 = arith.constant 0 : index
    %7 = vector.load %arg6[%c0_9, %c0_10] : memref<8x16xbf16, #tpu.memory_space<vmem>>, vector<8x16xbf16>
    %8 = arith.truncf %0 : vector<8x32xf32> to vector<8x32xbf16>
    %cst_11 = arith.constant dense<0.000000e+00> : vector<16x32xf32>
    %9 = tpu.matmul %6, %8, %cst_11 {dimension_numbers = #tpu.dot_dimension_numbers<[1], [0], [0], [1], [0, 0, 1, 1], [], []>} : vector<16x8xbf16>, vector<8x32xbf16>, vector<16x32xf32> -> vector<16x32xf32>
    %c0_12 = arith.constant 0 : index
    %c0_13 = arith.constant 0 : index
    %10 = vector.load %arg18[%c0_12, %c0_13] : memref<16x64xf32, #tpu.memory_space<vmem>>, vector<16x32xf32>
    tpu.vector_store %arg18[%c0_12, %c0_13], %9 {strides = array<i32>} : memref<16x64xf32, #tpu.memory_space<vmem>>, vector<16x32xf32>,
    %c0_14 = arith.constant 0 : index
    %c32 = arith.constant 32 : index
    %11 = vector.load %arg18[%c0_14, %c32] : memref<16x64xf32, #tpu.memory_space<vmem>>, vector<16x32xf32>
    tpu.vector_store %arg18[%c0_14, %c32], %5 {strides = array<i32>} : memref<16x64xf32, #tpu.memory_space<vmem>>, vector<16x32xf32>,
    %c0_15 = arith.constant 0 : index
    %c0_16 = arith.constant 0 : index
    %12 = vector.load %arg18[%c0_15, %c0_16] : memref<16x64xf32, #tpu.memory_space<vmem>>, vector<16x64xf32>
    %13 = arith.truncf %12 : vector<16x64xf32> to vector<16x64xbf16>
    %c0_17 = arith.constant 0 : index
    %c0_18 = arith.constant 0 : index
    %14 = vector.load %arg7[%c0_17, %c0_18] : memref<64x32xbf16, #tpu.memory_space<vmem>>, vector<64x32xbf16>
    %cst_19 = arith.constant dense<0.000000e+00> : vector<16x32xf32>
    %15 = tpu.matmul %13, %14, %cst_19 {dimension_numbers = #tpu.dot_dimension_numbers<[1], [0], [0], [1], [0, 0, 1, 1], [], []>} : vector<16x64xbf16>, vector<64x32xbf16>, vector<16x32xf32> -> vector<16x32xf32>
    %c0_20 = arith.constant 0 : index
    %c0_21 = arith.constant 0 : index
    %16 = vector.load %arg8[%c0_20, %c0_21] : memref<1x32xf32, #tpu.memory_space<vmem>>, vector<1x32xf32>
    %17 = vector.broadcast %16 : vector<1x32xf32> to vector<16x32xf32>
    %18 = arith.addf %15, %17 : vector<16x32xf32>
    %cst_22 = arith.constant 0.000000e+00 : f32
    %19 = vector.broadcast %cst_22 : f32 to vector<16x32xf32>
    %20 = arith.maximumf %18, %19 : vector<16x32xf32>
    %21 = arith.truncf %5 : vector<16x32xf32> to vector<16x32xbf16>
    %cst_23 = arith.constant dense<0.000000e+00> : vector<8x32xf32>
    %22 = tpu.matmul %7, %21, %cst_23 {dimension_numbers = #tpu.dot_dimension_numbers<[1], [0], [0], [1], [0, 0, 1, 1], [], []>} : vector<8x16xbf16>, vector<16x32xbf16>, vector<8x32xf32> -> vector<8x32xf32>
    %c0_24 = arith.constant 0 : index
    %c0_25 = arith.constant 0 : index
    %23 = vector.load %arg19[%c0_24, %c0_25] : memref<8x64xf32, #tpu.memory_space<vmem>>, vector<8x32xf32>
    tpu.vector_store %arg19[%c0_24, %c0_25], %22 {strides = array<i32>} : memref<8x64xf32, #tpu.memory_space<vmem>>, vector<8x32xf32>,
    %c0_26 = arith.constant 0 : index
    %c32_27 = arith.constant 32 : index
    %24 = vector.load %arg19[%c0_26, %c32_27] : memref<8x64xf32, #tpu.memory_space<vmem>>, vector<8x32xf32>
    tpu.vector_store %arg19[%c0_26, %c32_27], %0 {strides = array<i32>} : memref<8x64xf32, #tpu.memory_space<vmem>>, vector<8x32xf32>,
    %c0_28 = arith.constant 0 : index
    %c0_29 = arith.constant 0 : index
    %25 = vector.load %arg19[%c0_28, %c0_29] : memref<8x64xf32, #tpu.memory_space<vmem>>, vector<8x64xf32>
    %26 = arith.truncf %25 : vector<8x64xf32> to vector<8x64xbf16>
    %c0_30 = arith.constant 0 : index
    %c0_31 = arith.constant 0 : index
    %27 = vector.load %arg9[%c0_30, %c0_31] : memref<64x32xbf16, #tpu.memory_space<vmem>>, vector<64x32xbf16>
    %cst_32 = arith.constant dense<0.000000e+00> : vector<8x32xf32>
    %28 = tpu.matmul %26, %27, %cst_32 {dimension_numbers = #tpu.dot_dimension_numbers<[1], [0], [0], [1], [0, 0, 1, 1], [], []>} : vector<8x64xbf16>, vector<64x32xbf16>, vector<8x32xf32> -> vector<8x32xf32>
    %c0_33 = arith.constant 0 : index
    %c0_34 = arith.constant 0 : index
    %29 = vector.load %arg10[%c0_33, %c0_34] : memref<1x32xf32, #tpu.memory_space<vmem>>, vector<1x32xf32>
    %30 = vector.broadcast %29 : vector<1x32xf32> to vector<8x32xf32>
    %31 = arith.addf %28, %30 : vector<8x32xf32>
    %cst_35 = arith.constant 0.000000e+00 : f32
    %32 = vector.broadcast %cst_35 : f32 to vector<8x32xf32>
    %33 = arith.maximumf %31, %32 : vector<8x32xf32>
    %34 = arith.truncf %33 : vector<8x32xf32> to vector<8x32xbf16>
    %cst_36 = arith.constant dense<0.000000e+00> : vector<16x32xf32>
    %35 = tpu.matmul %6, %34, %cst_36 {dimension_numbers = #tpu.dot_dimension_numbers<[1], [0], [0], [1], [0, 0, 1, 1], [], []>} : vector<16x8xbf16>, vector<8x32xbf16>, vector<16x32xf32> -> vector<16x32xf32>
    %c0_37 = arith.constant 0 : index
    %c0_38 = arith.constant 0 : index
    %36 = vector.load %arg18[%c0_37, %c0_38] : memref<16x64xf32, #tpu.memory_space<vmem>>, vector<16x32xf32>
    tpu.vector_store %arg18[%c0_37, %c0_38], %35 {strides = array<i32>} : memref<16x64xf32, #tpu.memory_space<vmem>>, vector<16x32xf32>,
    %c0_39 = arith.constant 0 : index
    %c32_40 = arith.constant 32 : index
    %37 = vector.load %arg18[%c0_39, %c32_40] : memref<16x64xf32, #tpu.memory_space<vmem>>, vector<16x32xf32>
    tpu.vector_store %arg18[%c0_39, %c32_40], %20 {strides = array<i32>} : memref<16x64xf32, #tpu.memory_space<vmem>>, vector<16x32xf32>,
    %c0_41 = arith.constant 0 : index
    %c0_42 = arith.constant 0 : index
    %38 = vector.load %arg18[%c0_41, %c0_42] : memref<16x64xf32, #tpu.memory_space<vmem>>, vector<16x64xf32>
    %39 = arith.truncf %38 : vector<16x64xf32> to vector<16x64xbf16>
    %c0_43 = arith.constant 0 : index
    %c0_44 = arith.constant 0 : index
    %40 = vector.load %arg11[%c0_43, %c0_44] : memref<64x32xbf16, #tpu.memory_space<vmem>>, vector<64x32xbf16>
    %cst_45 = arith.constant dense<0.000000e+00> : vector<16x32xf32>
    %41 = tpu.matmul %39, %40, %cst_45 {dimension_numbers = #tpu.dot_dimension_numbers<[1], [0], [0], [1], [0, 0, 1, 1], [], []>} : vector<16x64xbf16>, vector<64x32xbf16>, vector<16x32xf32> -> vector<16x32xf32>
    %c0_46 = arith.constant 0 : index
    %c0_47 = arith.constant 0 : index
    %42 = vector.load %arg12[%c0_46, %c0_47] : memref<1x32xf32, #tpu.memory_space<vmem>>, vector<1x32xf32>
    %43 = vector.broadcast %42 : vector<1x32xf32> to vector<16x32xf32>
    %44 = arith.addf %41, %43 : vector<16x32xf32>
    %45 = arith.truncf %20 : vector<16x32xf32> to vector<16x32xbf16>
    %cst_48 = arith.constant dense<0.000000e+00> : vector<8x32xf32>
    %46 = tpu.matmul %7, %45, %cst_48 {dimension_numbers = #tpu.dot_dimension_numbers<[1], [0], [0], [1], [0, 0, 1, 1], [], []>} : vector<8x16xbf16>, vector<16x32xbf16>, vector<8x32xf32> -> vector<8x32xf32>
    %c0_49 = arith.constant 0 : index
    %c0_50 = arith.constant 0 : index
    %47 = vector.load %arg19[%c0_49, %c0_50] : memref<8x64xf32, #tpu.memory_space<vmem>>, vector<8x32xf32>
    tpu.vector_store %arg19[%c0_49, %c0_50], %46 {strides = array<i32>} : memref<8x64xf32, #tpu.memory_space<vmem>>, vector<8x32xf32>,
    %c0_51 = arith.constant 0 : index
    %c32_52 = arith.constant 32 : index
    %48 = vector.load %arg19[%c0_51, %c32_52] : memref<8x64xf32, #tpu.memory_space<vmem>>, vector<8x32xf32>
    tpu.vector_store %arg19[%c0_51, %c32_52], %33 {strides = array<i32>} : memref<8x64xf32, #tpu.memory_space<vmem>>, vector<8x32xf32>,
    %c0_53 = arith.constant 0 : index
    %c0_54 = arith.constant 0 : index
    %49 = vector.load %arg19[%c0_53, %c0_54] : memref<8x64xf32, #tpu.memory_space<vmem>>, vector<8x64xf32>
    %50 = arith.truncf %49 : vector<8x64xf32> to vector<8x64xbf16>
    %c0_55 = arith.constant 0 : index
    %c0_56 = arith.constant 0 : index
    %51 = vector.load %arg13[%c0_55, %c0_56] : memref<64x32xbf16, #tpu.memory_space<vmem>>, vector<64x32xbf16>
    %cst_57 = arith.constant dense<0.000000e+00> : vector<8x32xf32>
    %52 = tpu.matmul %50, %51, %cst_57 {dimension_numbers = #tpu.dot_dimension_numbers<[1], [0], [0], [1], [0, 0, 1, 1], [], []>} : vector<8x64xbf16>, vector<64x32xbf16>, vector<8x32xf32> -> vector<8x32xf32>
    %c0_58 = arith.constant 0 : index
    %c0_59 = arith.constant 0 : index
    %53 = vector.load %arg14[%c0_58, %c0_59] : memref<1x32xf32, #tpu.memory_space<vmem>>, vector<1x32xf32>
    %54 = vector.broadcast %53 : vector<1x32xf32> to vector<8x32xf32>
    %55 = arith.addf %52, %54 : vector<8x32xf32>
    %cst_60 = arith.constant dense<0.000000e+00> : vector<8x16xf32>
    %56 = tpu.matmul %55, %44, %cst_60 {dimension_numbers = #tpu.dot_dimension_numbers<[1], [1], [0], [0], [0, 0, 1, 0], [], []>} : vector<8x32xf32>, vector<16x32xf32>, vector<8x16xf32> -> vector<8x16xf32>
    %57 = tpu.iota {dimensions = array<i32: 0>} : vector<16x128xi32>
    %c0_61 = arith.constant 0 : index
    %c0_62 = arith.constant 0 : index
    %58 = vector.load %arg16[%c0_61, %c0_62] : memref<1x128xi32, #tpu.memory_space<vmem>>, vector<1x128xi32>
    %59 = vector.broadcast %58 : vector<1x128xi32> to vector<16x128xi32>
    %60 = arith.cmpi eq, %57, %59 : vector<16x128xi32>
    %61 = arith.extui %60 : vector<16x128xi1> to vector<16x128xi32>
    %62 = arith.sitofp %61 : vector<16x128xi32> to vector<16x128xf32>
    %cst_63 = arith.constant dense<0.000000e+00> : vector<8x128xf32>
    %63 = tpu.matmul %56, %62, %cst_63 {dimension_numbers = #tpu.dot_dimension_numbers<[1], [0], [0], [1], [0, 0, 1, 1], [], []>} : vector<8x16xf32>, vector<16x128xf32>, vector<8x128xf32> -> vector<8x128xf32>
    %64 = tpu.iota {dimensions = array<i32: 0>} : vector<8x128xi32>
    %c0_64 = arith.constant 0 : index
    %c0_65 = arith.constant 0 : index
    %65 = vector.load %arg15[%c0_64, %c0_65] : memref<1x128xi32, #tpu.memory_space<vmem>>, vector<1x128xi32>
    %66 = vector.broadcast %65 : vector<1x128xi32> to vector<8x128xi32>
    %67 = arith.cmpi eq, %64, %66 : vector<8x128xi32>
    %68 = arith.extui %67 : vector<8x128xi1> to vector<8x128xi32>
    %69 = arith.sitofp %68 : vector<8x128xi32> to vector<8x128xf32>
    %70 = arith.mulf %69, %63 : vector<8x128xf32>
    %cst_66 = arith.constant dense<0.000000e+00> : vector<128xf32>
    %71 = vector.multi_reduction <add>, %70, %cst_66 [0] : vector<8x128xf32> to vector<128xf32>
    %72 = vector.shape_cast %71 : vector<128xf32> to vector<1x128xf32>
    %c0_67 = arith.constant 0 : index
    %c0_68 = arith.constant 0 : index
    %73 = vector.load %arg17[%c0_67, %c0_68] : memref<1x128xf32, #tpu.memory_space<vmem>>, vector<1x128xf32>
    tpu.vector_store %arg17[%c0_67, %c0_68], %72 {strides = array<i32>} : memref<1x128xf32, #tpu.memory_space<vmem>>, vector<1x128xf32>,
    return
  }
  func.func @transform_0(%arg0: i32) -> (i32, i32) {
    %c0_i32 = arith.constant 0 : i32
    %c0_i32_0 = arith.constant 0 : i32
    %c0_i32_1 = arith.constant 0 : i32
    return %c0_i32, %c0_i32_0 : i32, i32
  }
  func.func @transform_1(%arg0: i32) -> (i32, i32) {
    %c0_i32 = arith.constant 0 : i32
    %c0_i32_0 = arith.constant 0 : i32
    %c0_i32_1 = arith.constant 0 : i32
    return %c0_i32, %c0_i32_0 : i32, i32
  }
  func.func @transform_2(%arg0: i32) -> (i32, i32) {
    %c0_i32 = arith.constant 0 : i32
    %c0_i32_0 = arith.constant 0 : i32
    %c0_i32_1 = arith.constant 0 : i32
    return %c0_i32, %c0_i32_0 : i32, i32
  }
  func.func @transform_3(%arg0: i32) -> (i32, i32) {
    %c0_i32 = arith.constant 0 : i32
    %c0_i32_0 = arith.constant 0 : i32
    %c0_i32_1 = arith.constant 0 : i32
    return %c0_i32, %c0_i32_0 : i32, i32
  }
  func.func @transform_4(%arg0: i32) -> (i32, i32) {
    %c0_i32 = arith.constant 0 : i32
    %c0_i32_0 = arith.constant 0 : i32
    %c0_i32_1 = arith.constant 0 : i32
    return %c0_i32, %c0_i32_0 : i32, i32
  }
  func.func @transform_5(%arg0: i32) -> (i32, i32) {
    %c0_i32 = arith.constant 0 : i32
    %c0_i32_0 = arith.constant 0 : i32
    %c0_i32_1 = arith.constant 0 : i32
    return %c0_i32, %c0_i32_0 : i32, i32
  }
  func.func @transform_6(%arg0: i32) -> (i32, i32) {
    %c0_i32 = arith.constant 0 : i32
    %c0_i32_0 = arith.constant 0 : i32
    %c0_i32_1 = arith.constant 0 : i32
    return %c0_i32, %c0_i32_0 : i32, i32
  }
  func.func @transform_7(%arg0: i32) -> (i32, i32) {
    %c0_i32 = arith.constant 0 : i32
    %c0_i32_0 = arith.constant 0 : i32
    %c0_i32_1 = arith.constant 0 : i32
    return %c0_i32, %c0_i32_0 : i32, i32
  }
  func.func @transform_8(%arg0: i32) -> (i32, i32) {
    %c0_i32 = arith.constant 0 : i32
    %c0_i32_0 = arith.constant 0 : i32
    %c0_i32_1 = arith.constant 0 : i32
    return %c0_i32, %c0_i32_0 : i32, i32
  }
  func.func @transform_9(%arg0: i32) -> (i32, i32) {
    %c0_i32 = arith.constant 0 : i32
    %c0_i32_0 = arith.constant 0 : i32
    %c0_i32_1 = arith.constant 0 : i32
    return %c0_i32, %c0_i32_0 : i32, i32
  }
  func.func @transform_10(%arg0: i32) -> (i32, i32) {
    %c0_i32 = arith.constant 0 : i32
    %c0_i32_0 = arith.constant 0 : i32
    %c0_i32_1 = arith.constant 0 : i32
    return %c0_i32, %c0_i32_0 : i32, i32
  }
  func.func @transform_11(%arg0: i32) -> (i32, i32) {
    %c0_i32 = arith.constant 0 : i32
    %c0_i32_0 = arith.constant 0 : i32
    %c0_i32_1 = arith.constant 0 : i32
    return %c0_i32, %c0_i32_0 : i32, i32
  }
  func.func @transform_12(%arg0: i32) -> (i32, i32) {
    %c0_i32 = arith.constant 0 : i32
    %c0_i32_0 = arith.constant 0 : i32
    %c0_i32_1 = arith.constant 0 : i32
    return %c0_i32, %c0_i32_0 : i32, i32
  }
  func.func @transform_13(%arg0: i32) -> (i32, i32) {
    %c0_i32 = arith.constant 0 : i32
    %c0_i32_0 = arith.constant 0 : i32
    %c0_i32_1 = arith.constant 0 : i32
    return %c0_i32, %c0_i32_0 : i32, i32
  }
  func.func @transform_14(%arg0: i32) -> (i32, i32) {
    %c0_i32 = arith.constant 0 : i32
    %c0_i32_0 = arith.constant 0 : i32
    %c0_i32_1 = arith.constant 0 : i32
    return %c0_i32, %c0_i32_0 : i32, i32
  }
  func.func @transform_15(%arg0: i32) -> (i32, i32) {
    %c0_i32 = arith.constant 0 : i32
    %c0_i32_0 = arith.constant 0 : i32
    %c0_i32_1 = arith.constant 0 : i32
    return %c0_i32, %c0_i32_0 : i32, i32
  }
  func.func @transform_16(%arg0: i32) -> (i32, i32) {
    %c0_i32 = arith.constant 0 : i32
    %c0_i32_0 = arith.constant 0 : i32
    %c0_i32_1 = arith.constant 0 : i32
    return %c0_i32, %c0_i32_0 : i32, i32
  }
}

</mosaic_0001>

<bundles_post_ra>
// kernel: tpu_custom_call.1
= control target key start
LH: loop header
LB: loop body
LE: loop exit
PB: predicated region body
PF: predicated region fallthrough
CT: control target
= control target key end

     0   :  { %s1383_s0 = inlined_call_operand.vmem [shape: f32[8,32], index: 0, kind: input, shape index: {}]   ;;  %s1384_s1 = inlined_call_operand.vmem [shape: bf16[16,32], index: 1, kind: input, shape index: {}]   ;;  %s1385_s2 = inlined_call_operand.vmem [shape: bf16[32,32], index: 2, kind: input, shape index: {}]   ;;  %s1386_s3 = inlined_call_operand.vmem [shape: f32[16,32], index: 3, kind: input, shape index: {}]   ;;  %s1387_s4 = inlined_call_operand.vmem [shape: bf16[16,8], index: 4, kind: input, shape index: {}]   ;;  %s1388_s5 = inlined_call_operand.vmem [shape: bf16[8,16], index: 5, kind: input, shape index: {}]   ;;  %s1389_s6 = inlined_call_operand.vmem [shape: bf16[64,32], index: 6, kind: input, shape index: {}]   ;;  %s1390_s7 = inlined_call_operand.vmem [shape: f32[1,32], index: 7, kind: input, shape index: {}]   ;;  %s1391_s8 = inlined_call_operand.vmem [shape: bf16[64,32], index: 8, kind: input, shape index: {}]   ;;  %s1392_s9 = inlined_call_operand.vmem [shape: f32[1,32], index: 9, kind: input, shape index: {}]   ;;  %s1393_s10 = inlined_call_operand.vmem [shape: bf16[64,32], index: 10, kind: input, shape index: {}]   ;;  %s1394_s11 = inlined_call_operand.vmem [shape: f32[1,32], index: 11, kind: input, shape index: {}]   ;;  %s1395_s12 = inlined_call_operand.vmem [shape: bf16[64,32], index: 12, kind: input, shape index: {}]   ;;  %s1396_s13 = inlined_call_operand.vmem [shape: f32[1,32], index: 13, kind: input, shape index: {}]   ;;  %s1397_s14 = inlined_call_operand.vmem [shape: s32[1,128], index: 14, kind: input, shape index: {}]   ;;  %s1398_s15 = inlined_call_operand.vmem [shape: s32[1,128], index: 15, kind: input, shape index: {}]   ;;  %s1399_s16 = inlined_call_operand.hbm [shape: f32[1,128], index: 16, kind: output, shape index: {}]  }
   0x1   :  { %1400 = sst [smem:[#allocation7_spill]] %s1383_s0 }
   0x2   :  { %v1072_v0 = vld [vmem:[%s1385_s2 + $0x8] sm:$0xff]   ;;  %v1114_v1 = vmov 0.0   ;;  %v1073_v2 = vld [vmem:[%s1385_s2] sm:$0xff]   ;;  %vm1115_vm0 = vmmov 0   ;;  %s1401_s27 = sld [smem:[#allocation7_spill]]  ;;  %vm139_vm1 = vcmask 1043456  }
   0x3   :  { %973 = vmatprep.subr.bf16.mxu0 %v1114_v1  ;;  %981 = vmatprep.subr.bf16.mxu1 %v1114_v1  ;;  %v1074_v4 = vld [vmem:[%s1384_s1] sm:$0xff]   ;;  %vm81_vm2 = vcmask 261120   ;;  %s1116_s0 = smov 32   ;;  %vm135_vm3 = vcmask 64512  }
   0x4   :  { %974 = vmatpush3.bf16.msra.mxu0 %v1072_v0  ;;  %977 = vmatprep.mubr.msk.bf16.mxu0 %vm1115_vm0, %v1114_v1  ;;  %v1226_v6 = vld [vmem:[%s1387_s4] sm:$0xff]  }
   0x5   :  { %975 = vmatprep.subr.bf16.mxu0 %v1114_v1  ;;  %983 = vmatprep.mubr.msk.bf16.mxu1 %vm1115_vm0, %v1114_v1 }
   0x8   :  { %v55_v3 = vld [vmem:[%s1401_s27] sm:$0xff]  ;;  %976 = vmatpush3.bf16.msra.mxu0 %v1073_v2 }
   0x9   :  { %v129_v5 = vpack.c.bf16 %v55_v3, %v55_v3  ;;  %333 = vrot.lane.b32.xlu0 %v55_v3, %s1116_s0  ;;  %999 = vmatprep.subr.bf16.mxu0 %v1114_v1 }
   0xb   :  { %v141_v7 = vsel %vm139_vm1, %v129_v5, 0  ;;  %978 = vmatmul.mubr.msk.bf16.vlgmr.msra.gmra.mxu0 %vm81_vm2, %v1074_v4 }
   0xc   :  { %982 = vmatpush3.bf16.msra.mxu1 %v141_v7  ;;  %1001 = vmatprep.mubr.msk.bf16.mxu0 %vm1115_vm0, %v1114_v1 }
   0xd   :  { %987 = vmatprep.subr.bf16.mxu1 %v1114_v1 }
   0xf   :  { %984 = vmatmul.mubr.msk.bf16.vlgmr.msra.gmra.mxu1 %vm135_vm3, %v1226_v6 }
  0x10   :  { %995 = vmatprep.mubr.msk.bf16.mxu1 %vm1115_vm0, %v1114_v1 }
  0x11   :  { %21 = vsyncpa [#allocation5], 0  ;;  %v1076_v8 = vld [vmem:[%s1389_s6 + $0x18] sm:$0xff]   ;;  %v1077_v9 = vld [vmem:[%s1389_s6 + $0x10] sm:$0xff]   ;;  %vm287_vm4 = vcmask 130048   ;;  %vm194_vm5 = vcmask 523520  }
  0x12   :  { %988 = vmatpush3.bf16.msra.mxu1 %v1076_v8  ;;  %v1078_v10 = vld [vmem:[%s1389_s6 + $0x8] sm:$0xff]   ;;  %v1079_v11 = vld [vmem:[%s1389_s6] sm:$0xff]   ;;  %v1080_v26 = vld [vmem:[%s1391_s8 + $0x18] sm:$0xff]   ;;  %vm239_vm6 = vcmask 523264  }
  0x13   :  { %989 = vmatprep.subr.bf16.mxu1 %v1114_v1  ;;  %v62_v12 = vld [vmem:[%s1386_s3] sm:$0xff]  ;;  %v63_v17 = vld [vmem:[%s1386_s3 + $0x8] sm:$0xff]  ;;  %v1081_v27 = vld [vmem:[%s1391_s8 + $0x10] sm:$0xff]  }
  0x14   :  { %v128_v25 = vld [vmem:[%s1388_s5] sm:$0xf]  ;;  %v1082_v28 = vld [vmem:[%s1391_s8 + $0x8] sm:$0xff]   ;;  %v1084_v52 = vld [vmem:[%s1395_s12 + $0x18] sm:$0xff]  }
  0x15   :  { %v1083_v29 = vld [vmem:[%s1391_s8] sm:$0xff]   ;;  %v1085_v53 = vld [vmem:[%s1395_s12 + $0x10] sm:$0xff]   ;;  %v1086_v54 = vld [vmem:[%s1395_s12 + $0x8] sm:$0xff]  }
  0x16   :  { %990 = vmatpush3.bf16.msra.mxu1 %v1077_v9  ;;  %v898_v42 = vld [vmem:[%s1390_s7] ss:$0 sm:$0xff]  ;;  %v1088_v2 = vld [vmem:[%s1393_s10 + $0x18] sm:$0xff]   ;;  %v1089_v3 = vld [vmem:[%s1393_s10 + $0x10] sm:$0xff]  }
  0x17   :  { %991 = vmatprep.subr.bf16.mxu1 %v1114_v1  ;;  %v905_v55 = vld [vmem:[%s1392_s9] ss:$0 sm:$0xff]  ;;  %v1090_v4 = vld [vmem:[%s1393_s10 + $0x8] sm:$0xff]  }
  0x18   :  { %v1087_v56 = vld [vmem:[%s1395_s12] sm:$0xff]  }
  0x19   :  { %v1091_v5 = vld [vmem:[%s1393_s10] sm:$0xff]  }
  0x1a   :  { %992 = vmatpush3.bf16.msra.mxu1 %v1078_v10 }
  0x1b   :  { %993 = vmatprep.subr.bf16.mxu1 %v1114_v1 }
  0x1e   :  { %994 = vmatpush3.bf16.msra.mxu1 %v1079_v11 }
  0x1f   :  { %1017 = vmatprep.subr.bf16.mxu1 %v1114_v1 }
  0x7b   :  { %v334_v30 = vpop.permute.xlu0 %333 }
  0xcb   :  { %v119_v13 = vpop.f32.mrf.mxu0 }
  0xcc   :  { %v120_v14 = vadd.f32 %v119_v13, %v62_v12 }
  0xcd   :  { %v979_v16 = vpop.f32.mrf.mxu0 }
  0xce   :  { %188 = vrot.lane.b32.xlu0 %v120_v14, %s1116_s0 }
  0xcf   :  { %v177_v15 = vpop.f32.mrf.mxu1  ;;  %v122_v19 = vpop.f32.mrf.mxu0 }
  0xd0   :  { %184 = vst.msk [vmem:[#allocation2] sm:$0xff] %vm81_vm2, %v177_v15  ;;  %v123_v20 = vadd.f32 %v122_v19, %v63_v17 }
  0xd1   :  { %v985_v18 = vpop.f32.mrf.mxu1  ;;  %v980_v22 = vpop.f32.mrf.mxu0 }
  0xd2   :  { %v286_v23 = vpack.c.bf16 %v123_v20, %v120_v14  ;;  %190 = vrot.lane.b32.xlu1 %v123_v20, %s1116_s0 }
  0xd3   :  { %v180_v21 = vpop.f32.mrf.mxu1 }
  0xd4   :  { %185 = vst.msk [vmem:[#allocation2 + $0x8] sm:$0xff] %vm81_vm2, %v180_v21  ;;  %1000 = vmatpush3.bf16.msra.mxu0 %v286_v23 }
  0xd5   :  { %v986_v24 = vpop.f32.mrf.mxu1  ;;  %1005 = vmatprep.subr.bf16.mxu0 %v1114_v1 }
  0xd7   :  { %1002 = vmatmul.mubr.msk.bf16.vlgmr.msra.gmra.mxu0 %vm287_vm4, %v128_v25 }
  0xd8   :  { %1006 = vmatpush3.bf16.msra.mxu0 %v1080_v26  ;;  %1013 = vmatprep.mubr.msk.bf16.mxu0 %vm1115_vm0, %v1114_v1 }
  0xd9   :  { %1007 = vmatprep.subr.bf16.mxu0 %v1114_v1 }
  0xdc   :  { %1008 = vmatpush3.bf16.msra.mxu0 %v1081_v27  ;;  %v775_v27 = vlaneseq }
  0xdd   :  { %1009 = vmatprep.subr.bf16.mxu0 %v1114_v1 }
  0xe0   :  { %1010 = vmatpush3.bf16.msra.mxu0 %v1082_v28 }
  0xe1   :  { %1011 = vmatprep.subr.bf16.mxu0 %v1114_v1 }
  0xe4   :  { %1012 = vmatpush3.bf16.msra.mxu0 %v1083_v29  ;;  %v912_v29 = vld [vmem:[%s1394_s11] ss:$0 sm:$0xff] }
  0xe5   :  { %1035 = vmatprep.subr.bf16.mxu0 %v1114_v1 }
 0x140   :  { %v189_v31 = vpop.permute.xlu0 %188 }
 0x141   :  { %195 = vst.msk [vmem:[#allocation2] sm:$0xff] %vm194_vm5, %v189_v31  ;;  %v776_v31 = vshrl.u32 %v775_v27, 7 }
 0x144   :  { %v191_v32 = vpop.permute.xlu1 %190 }
 0x145   :  { %196 = vst.msk [vmem:[#allocation2 + $0x8] sm:$0xff] %vm194_vm5, %v191_v32 }
 0x148   :  { %v197_v33 = vld [vmem:[#allocation2] sm:$0xff] }
 0x14c   :  { %v198_v34 = vld [vmem:[#allocation2 + $0x8] sm:$0xff] }
 0x14d   :  { %v199_v35 = vpack.c.bf16 %v198_v34, %v197_v33  ;;  %v777_v34 = vadd.s32 8, %v776_v31 }
 0x14f   :  { %996 = vmatmul.mubr.msk.bf16.vlgmr.msra.gmra.mxu1 %vm239_vm6, %v199_v35  ;;  %v919_v35 = vld [vmem:[%s1396_s13] ss:$0 sm:$0xff] }
 0x150   :  { %1019 = vmatprep.mubr.msk.bf16.mxu1 %vm1115_vm0, %v1114_v1 }
 0x197   :  { %v325_v36 = vpop.f32.mrf.mxu0 }
 0x198   :  { %331 = vst.msk [vmem:[#allocation3] sm:$0xff] %vm81_vm2, %v325_v36 }
 0x199   :  { %336 = vst.msk [vmem:[#allocation3] sm:$0xff] %vm194_vm5, %v334_v30  ;;  %v1003_v37 = vpop.f32.mrf.mxu0 }
 0x19a   :  { %v928_v37 = vld [vmem:[%s1398_s15] ss:$0 sm:$0xff]  ;;  %s1118_s15 = smov [#allocation4]  }
 0x19b   :  { %v328_v38 = vpop.f32.mrf.mxu0  ;;  %vm784_vm7 = vcmp.eq.s32.totalorder %v777_v34, %v928_v37  ;;  %vm783_vm8 = vcmp.eq.s32.totalorder %v776_v31, %v928_v37  ;;  %s884_s8 = sshll.u32 %s1118_s15, 4  ;;  %s885_s8 = int_to_ptr.vmem [resolvable:$true] %s884_s8 }
 0x19c   :  { %s1092_s17 = scalar_lea.vmem %s885_s8, 16  ;;  %s1096_s7 = scalar_lea.vmem %s885_s8, 32 }
 0x19d   :  { %v1004_v39 = vpop.f32.mrf.mxu0  ;;  %p1093_p0 = scmp.ne.s32.totalorder %s885_s8, %s1092_s17  ;;  %p1097_p1 = scmp.lt.s32.totalorder %s885_s8, %s885_s8 }
 0x19e   :  { %v1117_v39 = vmov 1.0   ;;  %p1098_p2 = scmp.lt.s32.totalorder %s1096_s7, %s1092_s17 }
 0x1a0   :  { %v337_v40 = vld [vmem:[#allocation3] sm:$0xff]  ;;  %p1099_p3 = por %p1098_p2, %p1097_p1 }
 0x1a1   :  { %v338_v41 = vpack.c.bf16 %v337_v40, %v337_v40 }
 0x1a2   :  { %p1100_p4 = pnand %p1099_p3, %p1093_p0 }
 0x1a3   :  { %1014 = vmatmul.mubr.msk.bf16.vlgmr.msra.gmra.mxu0 %vm239_vm6, %v338_v41 }
 0x1a4   :  { %1037 = vmatprep.mubr.msk.bf16.mxu0 %vm1115_vm0, %v1114_v1 }
 0x20f   :  { %v277_v43 = vpop.f32.mrf.mxu1 }
 0x210   :  { %v278_v44 = vadd.f32 %v898_v42, %v277_v43 }
 0x211   :  { %v997_v45 = vpop.f32.mrf.mxu1 }
 0x212   :  { %v284_v46 = vmax.f32 %v278_v44, 0.0 }
 0x213   :  { %v280_v47 = vpop.f32.mrf.mxu1 }
 0x214   :  { %v281_v48 = vadd.f32 %v898_v42, %v280_v47  ;;  %471 = vrot.lane.b32.xlu1 %v284_v46, %s1116_s0  ;;  %v934_v42 = vld [vmem:[%s1397_s14] ss:$0 sm:$0xff] }
 0x215   :  { %v998_v49 = vpop.f32.mrf.mxu1  ;;  %vm867_vm9 = vcmp.eq.s32.totalorder %v776_v31, %v934_v42 }
 0x216   :  { %v285_v50 = vmax.f32 %v281_v48, 0.0  ;;  %v935_v43 = vsel %vm867_vm9, 1.0, %v1114_v1 }
 0x218   :  { %v565_v51 = vpack.c.bf16 %v285_v50, %v284_v46  ;;  %473 = vrot.lane.b32.xlu0 %v285_v50, %s1116_s0 }
 0x21a   :  { %1036 = vmatpush3.bf16.msra.mxu0 %v565_v51 }
 0x21b   :  { %1041 = vmatprep.subr.bf16.mxu0 %v1114_v1 }
 0x21d   :  { %1038 = vmatmul.mubr.msk.bf16.vlgmr.msra.gmra.mxu0 %vm287_vm4, %v128_v25 }
 0x21e   :  { %1049 = vmatprep.mubr.msk.bf16.mxu0 %vm1115_vm0, %v1114_v1  ;;  %1042 = vmatpush3.bf16.msra.mxu0 %v1084_v52 }
 0x21f   :  { %1043 = vmatprep.subr.bf16.mxu0 %v1114_v1 }
 0x222   :  { %1044 = vmatpush3.bf16.msra.mxu0 %v1085_v53 }
 0x223   :  { %1045 = vmatprep.subr.bf16.mxu0 %v1114_v1 }
 0x226   :  { %1046 = vmatpush3.bf16.msra.mxu0 %v1086_v54 }
 0x227   :  { %1047 = vmatprep.subr.bf16.mxu0 %v1114_v1 }
 0x22a   :  { %1048 = vmatpush3.bf16.msra.mxu0 %v1087_v56 }
 0x263   :  { %v415_v57 = vpop.f32.mrf.mxu0 }
 0x264   :  { %v416_v58 = vadd.f32 %v905_v55, %v415_v57 }
 0x265   :  { %v1015_v59 = vpop.f32.mrf.mxu0 }
 0x266   :  { %v421_v60 = vmax.f32 %v416_v58, 0.0 }
 0x267   :  { %v418_v61 = vpop.f32.mrf.mxu0 }
 0x268   :  { %v422_v62 = vpack.c.bf16 %v421_v60, %v421_v60  ;;  %608 = vrot.lane.b32.xlu1 %v421_v60, %s1116_s0 }
 0x269   :  { %v1016_v63 = vpop.f32.mrf.mxu0 }
 0x26a   :  { %v424_v0 = vsel %vm139_vm1, %v422_v62, 0 }
 0x26b   :  { %1018 = vmatpush3.bf16.msra.mxu1 %v424_v0 }
 0x26c   :  { %1023 = vmatprep.subr.bf16.mxu1 %v1114_v1 }
 0x26e   :  { %1020 = vmatmul.mubr.msk.bf16.vlgmr.msra.gmra.mxu1 %vm135_vm3, %v1226_v6 }
 0x26f   :  { %1031 = vmatprep.mubr.msk.bf16.mxu1 %vm1115_vm0, %v1114_v1  ;;  %1024 = vmatpush3.bf16.msra.mxu1 %v1088_v2 }
 0x270   :  { %1025 = vmatprep.subr.bf16.mxu1 %v1114_v1 }
 0x273   :  { %1026 = vmatpush3.bf16.msra.mxu1 %v1089_v3 }
 0x274   :  { %1027 = vmatprep.subr.bf16.mxu1 %v1114_v1 }
 0x277   :  { %1028 = vmatpush3.bf16.msra.mxu1 %v1090_v4 }
 0x278   :  { %1029 = vmatprep.subr.bf16.mxu1 %v1114_v1 }
 0x27b   :  { %1030 = vmatpush3.bf16.msra.mxu1 %v1091_v5 }
 0x27c   :  { %1053 = vmatprep.subr.mxu1 %v1114_v1 }
 0x286   :  { %v472_v6 = vpop.permute.xlu1 %471 }
 0x28a   :  { %v474_v17 = vpop.permute.xlu0 %473 }
 0x2da   :  { %v609_v8 = vpop.permute.xlu1 %608 }
 0x2dd   :  { %v600_v7 = vpop.f32.mrf.mxu0 }
 0x2de   :  { %606 = vst.msk [vmem:[#allocation3] sm:$0xff] %vm81_vm2, %v600_v7 }
 0x2df   :  { %611 = vst.msk [vmem:[#allocation3] sm:$0xff] %vm194_vm5, %v609_v8  ;;  %v1039_v9 = vpop.f32.mrf.mxu0 }
 0x2e1   :  { %v603_v10 = vpop.f32.mrf.mxu0 }
 0x2e3   :  { %v1040_v11 = vpop.f32.mrf.mxu0 }
 0x2e6   :  { %v612_v12 = vld [vmem:[#allocation3] sm:$0xff] }
 0x2e7   :  { %v613_v13 = vpack.c.bf16 %v612_v12, %v612_v12 }
 0x2e9   :  { %1050 = vmatmul.mubr.msk.bf16.vlgmr.msra.gmra.mxu0 %vm239_vm6, %v613_v13 }
 0x32e   :  { %v460_v14 = vpop.f32.mrf.mxu1 }
 0x32f   :  { %467 = vst.msk [vmem:[#allocation2] sm:$0xff] %vm81_vm2, %v460_v14 }
 0x330   :  { %477 = vst.msk [vmem:[#allocation2] sm:$0xff] %vm194_vm5, %v472_v6  ;;  %v1021_v15 = vpop.f32.mrf.mxu1 }
 0x332   :  { %v463_v16 = vpop.f32.mrf.mxu1 }
 0x333   :  { %468 = vst.msk [vmem:[#allocation2 + $0x8] sm:$0xff] %vm81_vm2, %v463_v16 }
 0x334   :  { %478 = vst.msk [vmem:[#allocation2 + $0x8] sm:$0xff] %vm194_vm5, %v474_v17  ;;  %v1022_v18 = vpop.f32.mrf.mxu1 }
 0x337   :  { %v479_v19 = vld [vmem:[#allocation2] sm:$0xff] }
 0x33b   :  { %v480_v20 = vld [vmem:[#allocation2 + $0x8] sm:$0xff] }
 0x33c   :  { %v481_v21 = vpack.c.bf16 %v480_v20, %v479_v19 }
 0x33e   :  { %1032 = vmatmul.mubr.msk.bf16.vlgmr.msra.gmra.mxu1 %vm239_vm6, %v481_v21 }
 0x33f   :  { %1057 = vmatprep.mubr.msk.f32.mxu1 %vm1115_vm0, %v1114_v1 }
 0x3a9   :  { %v690_v22 = vpop.f32.mrf.mxu0 }
 0x3aa   :  { %v691_v38 = vadd.f32 %v919_v35, %v690_v22 }
 0x3ab   :  { %v1051_v23 = vpop.f32.mrf.mxu0 }
 0x3ad   :  { %v693_v24 = vpop.f32.mrf.mxu0 }
 0x3af   :  { %v1052_v25 = vpop.f32.mrf.mxu0 }
 0x3fe   :  { %v558_v26 = vpop.f32.mrf.mxu1 }
 0x3ff   :  { %v559_v36 = vadd.f32 %v912_v29, %v558_v26 }
 0x400   :  { %v1033_v28 = vpop.f32.mrf.mxu1 }
 0x402   :  { %v561_v30 = vpop.f32.mrf.mxu1 }
 0x403   :  { %v562_v32 = vadd.f32 %v912_v29, %v561_v30 }
 0x404   :  { %v1034_v33 = vpop.f32.mrf.mxu1 }
 0x405   :  { %1054 = vmatpush3.xpose.msk.msra.mxu1 %vm81_vm2, %v562_v32 }
 0x406   :  { %1055 = vmatprep.subr.mxu1 %v1114_v1 }
 0x409   :  { %1056 = vmatpush3.xpose.msk.msra.mxu1 %vm81_vm2, %v559_v36 }
 0x40a   :  { %1060 = vmatprep.subr.mxu1 %v1114_v1 }
 0x40c   :  { %1058 = vmatmul.mubr.msk.f32.vlgmr.msra.gmra.mxu1 %vm81_vm2, %v691_v38 }
 0x40d   :  { %1061 = vmatpush3.msk.msra.mxu1 %vm784_vm7, %v1117_v39  ;;  %1064 = vmatprep.mubr.msk.f32.mxu1 %vm1115_vm0, %v1114_v1 }
 0x40e   :  { %1062 = vmatprep.subr.mxu1 %v1114_v1 }
 0x40f   :  { %1063 = vmatpush3.msk.msra.mxu1 %vm783_vm8, %v1117_v39 }
 0x4cc   :  { %v771_v40 = vpop.f32.mrf.mxu1 }
 0x4cd   :  { %1065 = vmatmul.mubr.msk.f32.vlgmr.msra.gmra.mxu1 %vm287_vm4, %v771_v40 }
 0x4ce   :  { %v1059_v41 = vpop.f32.mrf.mxu1 }
 0x58d   :  { %v858_v44 = vpop.f32.mrf.mxu1 }
 0x58e   :  { %v870_v45 = vmul.f32 %v935_v43, %v858_v44 }
 0x58f   :  { %v1066_v46 = vpop.f32.mrf.mxu1 }
 0x590   :  { %v871_v47 = vrot.slane %v870_v45, 4 }
 0x592   :  { %v872_v48 = vadd.f32 %v871_v47, %v870_v45 }
 0x594   :  { %v873_v49 = vrot.slane %v872_v48, 2 }
 0x596   :  { %v874_v50 = vadd.f32 %v873_v49, %v872_v48 }
 0x598   :  { %v875_v51 = vrot.slane %v874_v50, 1 }
 0x59a   :  { %v876_v52 = vadd.f32 %v875_v51, %v874_v50 }
 0x59c   :  { %877 = vst [vmem:[#allocation4] sm:$0x1] %v876_v52 }
 0x59d   :  { %1103 = shalt.err (!%p1100_p4)
}
 0x59e   :  { %887 = dma.vmem_to_hbm [thread:$0]  %s885_s8, 16, %s1399_s16, [#allocation5]  }
 0x59f   :  { %1112 = dma.done.wait [#allocation5], 16  }
 0x5a0   :  { %1113 = vsyncadd [#allocation5], 4294967280 }
 0x5a1   :  { %891 = vsyncpa [#allocation5], 1 }

</bundles_post_ra>
